<compile_context>
chip_gen: v5e
topology: v5e:2x2
jax: 0.10.0
libtpu: 0.0.40
codegen_flags: <defaults>
</compile_context>

<pallas_src>
import functools

import jax
import jax.numpy as jnp
from jax.experimental import pallas as pl
from jax.experimental.pallas import tpu as pltpu

_MASK = -1e30  # large finite negative: exp(_MASK) == 0, avoids inf arithmetic


def _triplet_wrt_kernel(xb_tile_ref, xb_full_ref, sq_col_ref, sq_row_ref,
                        t_col_ref, t_row_ref, loss_ref, corr_ref,
                        *, normalize_feature):
    # ---- gram tile on the MXU: bf16 inputs, f32 accumulate ----------------
    gram = jax.lax.dot_general(
        xb_tile_ref[...], xb_full_ref[...],
        (((1,), (1,)), ((), ())),
        preferred_element_type=jnp.float32)                 # (TR, N) f32

    sq_t = sq_col_ref[...]                                  # (TR, 1) f32  ||x||^2 (raw)
    sq_f = sq_row_ref[...]                                  # (1,  N) f32

    if normalize_feature:
        # normalize(x) = x / (||x|| + 1e-12); fold the scaling into gram / sq
        # instead of re-normalizing the full RHS every grid step.
        inv_t = pl.reciprocal(jnp.sqrt(sq_t) + 1e-12, approx=True)   # (TR,1)
        inv_f = pl.reciprocal(jnp.sqrt(sq_f) + 1e-12, approx=True)   # (1,N)
        gram = gram * inv_t * inv_f
        sq_t = sq_t * inv_t * inv_t
        sq_f = sq_f * inv_f * inv_f

    # ---- pairwise euclidean distances (pdist_torch) -----------------------
    dist = jnp.sqrt(jnp.maximum(sq_t + sq_f - 2.0 * gram, 1e-12))    # (TR, N)

    # ---- positive / negative masks (int32 label compare) ------------------
    is_pos = t_col_ref[...] == t_row_ref[...]                         # (TR, N) bool

    # ---- weighted soft-max over positive distances ("furthest positive") --
    # max over dist*is_pos (fill 0.0 exactly like the reference), single exp,
    # weights never materialized: fp = sum(dist*e) / (sum(e) + 1e-6).
    max_ap = jnp.max(jnp.where(is_pos, dist, 0.0), axis=1, keepdims=True)
    e_ap = jnp.exp(jnp.where(is_pos, dist - max_ap, _MASK))           # masked -> 0
    z_ap = jnp.sum(e_ap, axis=1, keepdims=True) + 1e-6
    fp = jnp.sum(dist * e_ap, axis=1, keepdims=True) * pl.reciprocal(z_ap, approx=True)

    # ---- weighted soft-min over negative distances ("closest negative") ---
    max_an = jnp.max(jnp.where(is_pos, 0.0, -dist), axis=1, keepdims=True)
    e_an = jnp.exp(jnp.where(is_pos, _MASK, -dist - max_an))          # masked -> 0
    z_an = jnp.sum(e_an, axis=1, keepdims=True) + 1e-6
    cn = jnp.sum(dist * e_an, axis=1, keepdims=True) * pl.reciprocal(z_an, approx=True)

    d = cn - fp                                                       # (TR, 1)

    # SoftMarginLoss with target y=+1: softplus(-d), numerically stable form.
    row_loss = jnp.maximum(-d, 0.0) + jnp.log1p(jnp.exp(-jnp.abs(d)))

    # Per-tile partial reductions, splat across the lane-dense output block.
    loss_ref[...] = jnp.broadcast_to(
        jnp.sum(row_loss, keepdims=True), loss_ref.shape)
    corr_ref[...] = jnp.broadcast_to(
        jnp.sum((d >= 0.0).astype(jnp.int32), keepdims=True), corr_ref.shape)


def _pick_tile_rows(n, d):
    """Largest row tile (multiple of 16 for bf16 sublane packing) that divides N
    and keeps the ~6 live (TILE_R, N) f32 temporaries + the resident bf16 RHS
    comfortably inside the default scoped VMEM (v7x has only 64 MiB physical)."""
    budget = 8 * 1024 * 1024
    for cand in (512, 256, 128, 64, 32, 16):
        if n % cand == 0 and cand * n * 4 * 6 + n * d * 2 <= budget:
            return cand
    return n  # small / odd batch: single full-row tile (block == array is legal)


def triplet_loss_wrt(inputs, targets, normalize_feature=False, tile_rows=None):
    """JAX/Pallas equivalent of TripletLoss_WRT.forward.

    inputs:  (N, D) float features
    targets: (N,) integer class labels
    returns: (loss scalar float32, correct scalar int32)
    """
    n, dim = inputs.shape
    x32 = inputs.astype(jnp.float32)

    # One-time O(N*D) prep (NOT per row-tile): bf16 copy of the features for the
    # MXU (halves HBM->VMEM bytes of the grid-invariant RHS) and exact f32
    # squared row norms for the distance expansion.
    xbf = x32.astype(jnp.bfloat16)
    sq_col = jnp.sum(x32 * x32, axis=1, keepdims=True)        # (N, 1) f32
    sq_row = sq_col.reshape(1, n)                             # (1, N) f32

    t = targets.astype(jnp.int32)
    t_col = t.reshape(n, 1)
    t_row = t.reshape(1, n)

    tr = tile_rows if tile_rows is not None else _pick_tile_rows(n, dim)
    if n % tr != 0:
        tr = n                                                # fallback: single tile
    num_tiles = n // tr

    kernel = functools.partial(_triplet_wrt_kernel,
                               normalize_feature=normalize_feature)

    cost = pl.CostEstimate(
        flops=int(2 * n * n * dim + 24 * n * n),
        transcendentals=int(3 * n * n),                       # 2 exp + 1 sqrt per entry
        bytes_accessed=int(n * dim * 4 + n * 16 + num_tiles * 8 * 128 * 8))

    loss_part, corr_part = pl.pallas_call(
        kernel,
        grid=(num_tiles,),
        out_shape=(jax.ShapeDtypeStruct((num_tiles * 8, 128), jnp.float32),
                   jax.ShapeDtypeStruct((num_tiles * 8, 128), jnp.int32)),
        in_specs=[
            pl.BlockSpec((tr, dim), lambda i: (i, 0)),        # bf16 row tile (LHS)
            pl.BlockSpec((n, dim), lambda i: (0, 0)),         # bf16 full x (RHS, invariant)
            pl.BlockSpec((tr, 1), lambda i: (i, 0)),          # f32 ||x||^2 (tile rows)
            pl.BlockSpec((1, n), lambda i: (0, 0)),           # f32 ||x||^2 (all columns)
            pl.BlockSpec((tr, 1), lambda i: (i, 0)),          # int32 labels (tile rows)
            pl.BlockSpec((1, n), lambda i: (0, 0)),           # int32 labels (all columns)
        ],
        out_specs=(
            pl.BlockSpec((8, 128), lambda i: (i, 0)),         # per-tile loss partial sum
            pl.BlockSpec((8, 128), lambda i: (i, 0)),         # per-tile correct count
        ),
        compiler_params=pltpu.CompilerParams(
            dimension_semantics=("parallel",),                # row tiles are independent
            vmem_limit_bytes=48 * 1024 * 1024),
        cost_estimate=cost,
    )(xbf, xbf, sq_col, sq_row, t_col, t_row)

    # Tiny final reduction over num_tiles scalars (one value per (8,128) block).
    loss = jnp.sum(loss_part[0::8, 0]) / jnp.float32(n)
    correct = jnp.sum(corr_part[0::8, 0])
    return loss, correct


# ----------------------------- references (verification) -----------------------------

def _kernel_math_reference(inputs, targets, normalize_feature=False):
    """Pure-JAX mirror of the kernel's numerics (bf16 gram, folded softmax)."""
    x = inputs.astype(jnp.float32)
    xb = x.astype(jnp.bfloat16)
    sq_c = jnp.sum(x * x, axis=1, keepdims=True)
    sq_r = sq_c.T
    gram = jnp.dot(xb, xb.T, preferred_element_type=jnp.float32)
    if normalize_feature:
        inv_c = 1.0 / (jnp.sqrt(sq_c) + 1e-12)
        inv_r = inv_c.T
        gram = gram * inv_c * inv_r
        sq_c = sq_c * inv_c * inv_c
        sq_r = sq_r * inv_r * inv_r
    dist = jnp.sqrt(jnp.maximum(sq_c + sq_r - 2.0 * gram, 1e-12))
    t = targets.astype(jnp.int32).reshape(-1, 1)
    is_pos = t == t.T
    max_ap = jnp.max(jnp.where(is_pos, dist, 0.0), axis=1, keepdims=True)
    e_ap = jnp.exp(jnp.where(is_pos, dist - max_ap, _MASK))
    fp = jnp.sum(dist * e_ap, axis=1) / (jnp.sum(e_ap, axis=1) + 1e-6)
    max_an = jnp.max(jnp.where(is_pos, 0.0, -dist), axis=1, keepdims=True)
    e_an = jnp.exp(jnp.where(is_pos, _MASK, -dist - max_an))
    cn = jnp.sum(dist * e_an, axis=1) / (jnp.sum(e_an, axis=1) + 1e-6)
    d = cn - fp
    loss = jnp.mean(jnp.maximum(-d, 0.0) + jnp.log1p(jnp.exp(-jnp.abs(d))))
    correct = jnp.sum((d >= 0.0).astype(jnp.int32))
    return loss, correct


def _reference_f32(inputs, targets, normalize_feature=False):
    """Faithful f32 translation of the PyTorch module."""
    x = inputs.astype(jnp.float32)
    if normalize_feature:
        x = x / (jnp.linalg.norm(x, axis=-1, keepdims=True) + 1e-12)
    sq = jnp.sum(x * x, axis=1, keepdims=True)
    dist = jnp.sqrt(jnp.clip(sq + sq.T - 2.0 * (x @ x.T), 1e-12, None))
    t = targets.reshape(-1, 1)
    is_pos = (t == t.T).astype(jnp.float32)
    is_neg = 1.0 - is_pos
    dist_ap = dist * is_pos
    dist_an = dist * is_neg

    def sw(dd, mask):
        max_v = jnp.max(dd * mask, axis=1, keepdims=True)
        diff = dd - max_v
        z = jnp.sum(jnp.exp(diff) * mask, axis=1, keepdims=True) + 1e-6
        return jnp.exp(diff) * mask / z

    fp = jnp.sum(dist_ap * sw(dist_ap, is_pos), axis=1)
    cn = jnp.sum(dist_an * sw(-dist_an, is_neg), axis=1)
    d = cn - fp
    loss = jnp.mean(jnp.maximum(-d, 0.0) + jnp.log1p(jnp.exp(-jnp.abs(d))))
    correct = jnp.sum((d >= 0.0).astype(jnp.int32))
    return loss, correct


if __name__ == "__main__":
    key = jax.random.PRNGKey(0)
    kc, kn = jax.random.split(key)
    num_ids, per_id, dim = 8, 4, 32
    n = num_ids * per_id                                   # batch = 32 embeddings

    # Clustered embeddings (8 identities x 4 samples) -> well-conditioned margins.
    centers = jax.random.normal(kc, (num_ids, dim), dtype=jnp.float32)
    labels = jnp.repeat(jnp.arange(num_ids, dtype=jnp.int32), per_id)
    feats = centers[labels] + 0.35 * jax.random.normal(kn, (n, dim), dtype=jnp.float32)

    for norm in (False, True):
        for tile in (16, None):       # 16 -> 2-step "parallel" grid; None -> auto tile
            loss, correct = triplet_loss_wrt(
                feats, labels, normalize_feature=norm, tile_rows=tile)
            loss = jax.block_until_ready(loss)
            correct = jax.block_until_ready(correct)

            ml, mc = _kernel_math_reference(feats, labels, normalize_feature=norm)
            fl, fc = _reference_f32(feats, labels, normalize_feature=norm)

            # Tight check vs. a reference that mirrors the kernel math exactly.
            assert jnp.allclose(loss, ml, rtol=1e-3, atol=5e-3), (norm, tile, loss, ml)
            assert int(correct) == int(mc), (norm, tile, int(correct), int(mc))
            # Loose semantic check vs. the faithful f32 module (bf16 gram tolerance).
            assert jnp.allclose(loss, fl, rtol=5e-2, atol=5e-2), (norm, tile, loss, fl)
            assert int(correct) == int(fc), (norm, tile, int(correct), int(fc))

    print("KERNEL_OK")
</pallas_src>

<mosaic_0001>
module attributes {stable_mosaic.version = 11 : i64} {
  func.func @_triplet_wrt_kernel(%arg0: i32, %arg1: memref<16x32xbf16, #tpu.memory_space<vmem>>, %arg2: memref<32x32xbf16, #tpu.memory_space<vmem>>, %arg3: memref<16x1xf32, #tpu.memory_space<vmem>>, %arg4: memref<1x32xf32, #tpu.memory_space<vmem>>, %arg5: memref<16x1xi32, #tpu.memory_space<vmem>>, %arg6: memref<1x32xi32, #tpu.memory_space<vmem>>, %arg7: memref<8x128xf32, #tpu.memory_space<vmem>>, %arg8: memref<8x128xi32, #tpu.memory_space<vmem>>) attributes {dimension_semantics = [#tpu.dimension_semantics<parallel>], iteration_bounds = array<i64: 2>, scalar_prefetch = 0 : i64, scratch_operands = 0 : i64, tpu.core_type = #tpu.core_type<tc>, window_params = [{transform_indices = @transform_0, window_bounds = array<i64: 16, 32>}, {pipeline_mode = #tpu.pipeline_mode<synchronous>, transform_indices = @transform_1, window_bounds = array<i64: 32, 32>}, {transform_indices = @transform_2, window_bounds = array<i64: 16, 1>}, {pipeline_mode = #tpu.pipeline_mode<synchronous>, transform_indices = @transform_3, window_bounds = array<i64: 1, 32>}, {transform_indices = @transform_4, window_bounds = array<i64: 16, 1>}, {pipeline_mode = #tpu.pipeline_mode<synchronous>, transform_indices = @transform_5, window_bounds = array<i64: 1, 32>}, {transform_indices = @transform_6, window_bounds = array<i64: 8, 128>}, {transform_indices = @transform_7, window_bounds = array<i64: 8, 128>}]} {
    %c0 = arith.constant 0 : index
    %c0_0 = arith.constant 0 : index
    %0 = vector.load %arg1[%c0, %c0_0] : memref<16x32xbf16, #tpu.memory_space<vmem>>, vector<16x32xbf16>
    %c0_1 = arith.constant 0 : index
    %c0_2 = arith.constant 0 : index
    %1 = vector.load %arg2[%c0_1, %c0_2] : memref<32x32xbf16, #tpu.memory_space<vmem>>, vector<32x32xbf16>
    %cst = arith.constant dense<0.000000e+00> : vector<16x32xf32>
    %2 = tpu.matmul %0, %1, %cst {dimension_numbers = #tpu.dot_dimension_numbers<[1], [1], [0], [0], [0, 0, 1, 0], [], []>} : vector<16x32xbf16>, vector<32x32xbf16>, vector<16x32xf32> -> vector<16x32xf32>
    %c0_3 = arith.constant 0 : index
    %c0_4 = arith.constant 0 : index
    %3 = vector.load %arg3[%c0_3, %c0_4] : memref<16x1xf32, #tpu.memory_space<vmem>>, vector<16x1xf32>
    %c0_5 = arith.constant 0 : index
    %c0_6 = arith.constant 0 : index
    %4 = vector.load %arg4[%c0_5, %c0_6] : memref<1x32xf32, #tpu.memory_space<vmem>>, vector<1x32xf32>
    %5 = vector.broadcast %3 : vector<16x1xf32> to vector<16x32xf32>
    %6 = vector.broadcast %4 : vector<1x32xf32> to vector<16x32xf32>
    %7 = arith.addf %5, %6 : vector<16x32xf32>
    %cst_7 = arith.constant 2.000000e+00 : f32
    %8 = vector.broadcast %cst_7 : f32 to vector<16x32xf32>
    %9 = arith.mulf %8, %2 : vector<16x32xf32>
    %10 = arith.subf %7, %9 : vector<16x32xf32>
    %cst_8 = arith.constant 9.99999996E-13 : f32
    %11 = vector.broadcast %cst_8 : f32 to vector<16x32xf32>
    %12 = arith.maximumf %10, %11 : vector<16x32xf32>
    %13 = math.sqrt %12 : vector<16x32xf32>
    %c0_9 = arith.constant 0 : index
    %c0_10 = arith.constant 0 : index
    %14 = vector.load %arg5[%c0_9, %c0_10] : memref<16x1xi32, #tpu.memory_space<vmem>>, vector<16x1xi32>
    %c0_11 = arith.constant 0 : index
    %c0_12 = arith.constant 0 : index
    %15 = vector.load %arg6[%c0_11, %c0_12] : memref<1x32xi32, #tpu.memory_space<vmem>>, vector<1x32xi32>
    %16 = vector.broadcast %14 : vector<16x1xi32> to vector<16x32xi32>
    %17 = vector.broadcast %15 : vector<1x32xi32> to vector<16x32xi32>
    %18 = arith.cmpi eq, %16, %17 : vector<16x32xi32>
    %cst_13 = arith.constant 0.000000e+00 : f32
    %19 = vector.broadcast %cst_13 : f32 to vector<16x32xf32>
    %20 = arith.select %18, %13, %19 : vector<16x32xi1>, vector<16x32xf32>
    %cst_14 = arith.constant dense<0xFF800000> : vector<16xf32>
    %21 = vector.multi_reduction <maximumf>, %20, %cst_14 [1] : vector<16x32xf32> to vector<16xf32>
    %22 = vector.shape_cast %21 : vector<16xf32> to vector<16x1xf32>
    %23 = vector.broadcast %22 : vector<16x1xf32> to vector<16x32xf32>
    %24 = arith.subf %13, %23 : vector<16x32xf32>
    %cst_15 = arith.constant -1.000000e+30 : f32
    %25 = vector.broadcast %cst_15 : f32 to vector<16x32xf32>
    %26 = arith.select %18, %24, %25 : vector<16x32xi1>, vector<16x32xf32>
    %27 = math.exp %26 : vector<16x32xf32>
    %cst_16 = arith.constant dense<0.000000e+00> : vector<16xf32>
    %28 = vector.multi_reduction <add>, %27, %cst_16 [1] : vector<16x32xf32> to vector<16xf32>
    %29 = vector.shape_cast %28 : vector<16xf32> to vector<16x1xf32>
    %cst_17 = arith.constant 9.99999997E-7 : f32
    %30 = vector.broadcast %cst_17 : f32 to vector<16x1xf32>
    %31 = arith.addf %29, %30 : vector<16x1xf32>
    %32 = arith.mulf %13, %27 : vector<16x32xf32>
    %cst_18 = arith.constant dense<0.000000e+00> : vector<16xf32>
    %33 = vector.multi_reduction <add>, %32, %cst_18 [1] : vector<16x32xf32> to vector<16xf32>
    %34 = vector.shape_cast %33 : vector<16xf32> to vector<16x1xf32>
    %35 = tpu.reciprocal %31 {approx = true} : vector<16x1xf32> -> vector<16x1xf32>
    %36 = arith.mulf %34, %35 : vector<16x1xf32>
    %cst_19 = arith.constant 0.000000e+00 : f32
    %37 = vector.broadcast %cst_19 : f32 to vector<16x32xf32>
    %38 = arith.subf %37, %13 : vector<16x32xf32>
    %cst_20 = arith.constant 0.000000e+00 : f32
    %39 = vector.broadcast %cst_20 : f32 to vector<16x32xf32>
    %40 = arith.select %18, %39, %38 : vector<16x32xi1>, vector<16x32xf32>
    %cst_21 = arith.constant dense<0xFF800000> : vector<16xf32>
    %41 = vector.multi_reduction <maximumf>, %40, %cst_21 [1] : vector<16x32xf32> to vector<16xf32>
    %42 = vector.shape_cast %41 : vector<16xf32> to vector<16x1xf32>
    %cst_22 = arith.constant 0.000000e+00 : f32
    %43 = vector.broadcast %cst_22 : f32 to vector<16x32xf32>
    %44 = arith.subf %43, %13 : vector<16x32xf32>
    %45 = vector.broadcast %42 : vector<16x1xf32> to vector<16x32xf32>
    %46 = arith.subf %44, %45 : vector<16x32xf32>
    %cst_23 = arith.constant -1.000000e+30 : f32
    %47 = vector.broadcast %cst_23 : f32 to vector<16x32xf32>
    %48 = arith.select %18, %47, %46 : vector<16x32xi1>, vector<16x32xf32>
    %49 = math.exp %48 : vector<16x32xf32>
    %cst_24 = arith.constant dense<0.000000e+00> : vector<16xf32>
    %50 = vector.multi_reduction <add>, %49, %cst_24 [1] : vector<16x32xf32> to vector<16xf32>
    %51 = vector.shape_cast %50 : vector<16xf32> to vector<16x1xf32>
    %cst_25 = arith.constant 9.99999997E-7 : f32
    %52 = vector.broadcast %cst_25 : f32 to vector<16x1xf32>
    %53 = arith.addf %51, %52 : vector<16x1xf32>
    %54 = arith.mulf %13, %49 : vector<16x32xf32>
    %cst_26 = arith.constant dense<0.000000e+00> : vector<16xf32>
    %55 = vector.multi_reduction <add>, %54, %cst_26 [1] : vector<16x32xf32> to vector<16xf32>
    %56 = vector.shape_cast %55 : vector<16xf32> to vector<16x1xf32>
    %57 = tpu.reciprocal %53 {approx = true} : vector<16x1xf32> -> vector<16x1xf32>
    %58 = arith.mulf %56, %57 : vector<16x1xf32>
    %59 = arith.subf %58, %36 : vector<16x1xf32>
    %cst_27 = arith.constant 0.000000e+00 : f32
    %60 = vector.broadcast %cst_27 : f32 to vector<16x1xf32>
    %61 = arith.subf %60, %59 : vector<16x1xf32>
    %cst_28 = arith.constant 0.000000e+00 : f32
    %62 = vector.broadcast %cst_28 : f32 to vector<16x1xf32>
    %63 = arith.maximumf %61, %62 : vector<16x1xf32>
    %64 = math.absf %59 : vector<16x1xf32>
    %cst_29 = arith.constant 0.000000e+00 : f32
    %65 = vector.broadcast %cst_29 : f32 to vector<16x1xf32>
    %66 = arith.subf %65, %64 : vector<16x1xf32>
    %67 = math.exp %66 : vector<16x1xf32>
    %68 = math.log1p %67 : vector<16x1xf32>
    %69 = arith.addf %63, %68 : vector<16x1xf32>
    %70 = vector.shape_cast %69 : vector<16x1xf32> to vector<1x16x1xf32>
    %cst_30 = arith.constant dense<0.000000e+00> : vector<1xf32>
    %71 = vector.multi_reduction <add>, %70, %cst_30 [1, 2] : vector<1x16x1xf32> to vector<1xf32>
    %72 = vector.shape_cast %71 : vector<1xf32> to vector<1x1x1xf32>
    %73 = vector.extract %72[0, 0, 0] : f32 from vector<1x1x1xf32>
    %74 = vector.broadcast %73 : f32 to vector<1x1xf32>
    %75 = vector.shape_cast %74 : vector<1x1xf32> to vector<1x1xf32>
    %76 = vector.broadcast %75 : vector<1x1xf32> to vector<8x128xf32>
    %c0_31 = arith.constant 0 : index
    %c0_32 = arith.constant 0 : index
    %77 = vector.load %arg7[%c0_31, %c0_32] : memref<8x128xf32, #tpu.memory_space<vmem>>, vector<8x128xf32>
    tpu.vector_store %arg7[%c0_31, %c0_32], %76 {strides = array<i32>} : memref<8x128xf32, #tpu.memory_space<vmem>>, vector<8x128xf32>,
    %cst_33 = arith.constant 0.000000e+00 : f32
    %78 = vector.broadcast %cst_33 : f32 to vector<16x1xf32>
    %79 = arith.cmpf oge, %59, %78 : vector<16x1xf32>
    %80 = arith.extui %79 : vector<16x1xi1> to vector<16x1xi32>
    %81 = vector.shape_cast %80 : vector<16x1xi32> to vector<1x16x1xi32>
    %cst_34 = arith.constant dense<0> : vector<1xi32>
    %82 = vector.multi_reduction <add>, %81, %cst_34 [1, 2] : vector<1x16x1xi32> to vector<1xi32>
    %83 = vector.shape_cast %82 : vector<1xi32> to vector<1x1x1xi32>
    %84 = vector.extract %83[0, 0, 0] : i32 from vector<1x1x1xi32>
    %85 = vector.broadcast %84 : i32 to vector<1x1xi32>
    %86 = vector.shape_cast %85 : vector<1x1xi32> to vector<1x1xi32>
    %87 = vector.broadcast %86 : vector<1x1xi32> to vector<8x128xi32>
    %c0_35 = arith.constant 0 : index
    %c0_36 = arith.constant 0 : index
    %88 = vector.load %arg8[%c0_35, %c0_36] : memref<8x128xi32, #tpu.memory_space<vmem>>, vector<8x128xi32>
    tpu.vector_store %arg8[%c0_35, %c0_36], %87 {strides = array<i32>} : memref<8x128xi32, #tpu.memory_space<vmem>>, vector<8x128xi32>,
    return
  }
  func.func @transform_0(%arg0: i32) -> (i32, i32) {
    %c0_i32 = arith.constant 0 : i32
    %c0_i32_0 = arith.constant 0 : i32
    return %arg0, %c0_i32 : i32, i32
  }
  func.func @transform_1(%arg0: i32) -> (i32, i32) {
    %c0_i32 = arith.constant 0 : i32
    %c0_i32_0 = arith.constant 0 : i32
    %c0_i32_1 = arith.constant 0 : i32
    return %c0_i32, %c0_i32_0 : i32, i32
  }
  func.func @transform_2(%arg0: i32) -> (i32, i32) {
    %c0_i32 = arith.constant 0 : i32
    %c0_i32_0 = arith.constant 0 : i32
    return %arg0, %c0_i32 : i32, i32
  }
  func.func @transform_3(%arg0: i32) -> (i32, i32) {
    %c0_i32 = arith.constant 0 : i32
    %c0_i32_0 = arith.constant 0 : i32
    %c0_i32_1 = arith.constant 0 : i32
    return %c0_i32, %c0_i32_0 : i32, i32
  }
  func.func @transform_4(%arg0: i32) -> (i32, i32) {
    %c0_i32 = arith.constant 0 : i32
    %c0_i32_0 = arith.constant 0 : i32
    return %arg0, %c0_i32 : i32, i32
  }
  func.func @transform_5(%arg0: i32) -> (i32, i32) {
    %c0_i32 = arith.constant 0 : i32
    %c0_i32_0 = arith.constant 0 : i32
    %c0_i32_1 = arith.constant 0 : i32
    return %c0_i32, %c0_i32_0 : i32, i32
  }
  func.func @transform_6(%arg0: i32) -> (i32, i32) {
    %c0_i32 = arith.constant 0 : i32
    %c0_i32_0 = arith.constant 0 : i32
    return %arg0, %c0_i32 : i32, i32
  }
  func.func @transform_7(%arg0: i32) -> (i32, i32) {
    %c0_i32 = arith.constant 0 : i32
    %c0_i32_0 = arith.constant 0 : i32
    return %arg0, %c0_i32 : i32, i32
  }
}

</mosaic_0001>

<bundles_post_ra>
// kernel: tpu_custom_call.1
= control target key start
LH: loop header
LB: loop body
LE: loop exit
PB: predicated region body
PF: predicated region fallthrough
CT: control target
= control target key end

     0   :  { %s1141_s0 = inlined_call_operand.vmem [shape: bf16[32,32], index: 0, kind: input, shape index: {}]   ;;  %s1142_s1 = inlined_call_operand.vmem [shape: bf16[32,32], index: 1, kind: input, shape index: {}]   ;;  %s1143_s2 = inlined_call_operand.vmem [shape: f32[32,1], index: 2, kind: input, shape index: {}]   ;;  %s1144_s3 = inlined_call_operand.vmem [shape: f32[1,32], index: 3, kind: input, shape index: {}]   ;;  %s1145_s4 = inlined_call_operand.vmem [shape: s32[32,1], index: 4, kind: input, shape index: {}]   ;;  %s1146_s5 = inlined_call_operand.vmem [shape: s32[1,32], index: 5, kind: input, shape index: {}]   ;;  %s1147_s6 = inlined_call_operand.hbm [shape: f32[16,128], index: 6, kind: output, shape index: {0}]   ;;  %s1148_s7 = inlined_call_operand.hbm [shape: s32[16,128], index: 7, kind: output, shape index: {1}]  }
   0x1   :  { %1149 = sst [smem:[#allocation8_spill]] %s1141_s0 }
   0x2   :  { %13 = vsyncpa [#allocation3], 0 }
   0x3   :  { %15 = vsyncpa [#allocation3 + $0x1], 0 }
   0x4   :  { %16 = vsyncpa [#allocation5], 0 }
   0x5   :  { %18 = vsyncpa [#allocation5 + $0x1], 0  ;;  %s980_s24 = smov 0   ;;  %s982_s25 = smov 0  }
   0x6   :  { %s984_s26 = smov 0   ;;  %s986_s27 = smov 0  }
   0x7 LB: > { %s1001_s28 = sadd.s32 4294967295, %s937_s27   ;;  %s728_s29 = sadd.s32 4294967294, %s937_s27   ;;  %s937_s27 = sphi %s986_s27, %s1156_s27   ;;  %s933_s26 = sphi %s984_s26, %s1155_s26   ;;  %s929_s25 = sphi %s982_s25, %s1154_s25   ;;  %s925_s24 = sphi %s980_s24, %s1153_s24  }
   0x8   : > { %s1005_s30 = sadd.s32 1, %s937_s27   ;;  %s172_s8 = sadd.s32 1, %s933_s26 }
   0x9   : > { %s169_s9 = ssub.s32 %s937_s27, %s1005_s30  ;;  %p182_p0 = scmp.ne.s32.totalorder %s933_s26, %s929_s25 }
   0xa   : > { %p170_p1 = scmp.eq.s32.totalorder %s169_s9, 0  ;;  %p183_p2 = scmp.eq.s32.totalorder %s1001_s28, 1 }
   0xb   : > { %p188_p3 = scmp.ne.s32.totalorder %s929_s25, %s925_s24  ;;  %p189_p4 = scmp.eq.s32.totalorder %s728_s29, 1 }
   0xc   : > { %s1016_s10 = scalar_select %p170_p1, %s933_s26, %s172_s8  }
   0xd   : > { %p1018_p5 = por %p183_p2, %p182_p0  ;;  %p1022_p6 = por %p189_p4, %p188_p3 }
   0xe   : > { %p731_p7 = scmp.ge.s32.totalorder %s937_s27, 1  ;;  %p269_p8 = scmp.lt.s32.totalorder %s937_s27, 3 }
  0x10   : > { %p270_p9 = pnand %p731_p7, %p269_p8 }
  0x11   : > { %s734_s15 = sshll.u32 (!%p270_p9), %s1001_s28, 1  ;;  %s1152_s0 = sld [smem:[#allocation8_spill]] (!%p270_p9) }
  0x12   : > { %273 = sbr.rel (%p270_p9) target bundleno = 709 (0x2c5), region = 44  ;;  %p317_p10 = scmp.lt.s32.totalorder (!%p270_p9), %s734_s15, 3 }
  0x13   : > { %s1085_s19 = sand.u32 (!%p270_p9), 1, %s929_s25  }
  0x14   : > { %s732_s20 = sshll.u32 (!%p270_p9), %s1085_s19, 3  ;;  %s578_s23 = scalar_lea.sflag (!%p270_p9), [#allocation3], %s1085_s19 }
  0x15   : > { %s308_s17 = scalar_lea.vmem (!%p270_p9), [#allocation2], %s732_s20 }
  0x17   : > { %v761_v0 = vld [vmem:[%s1142_s1 + $0x8] sm:$0xff]  ;;  %vm356_vm0 = vcmask 261120   ;;  %v939_v1 = vmov 0   ;;  %s1158_s15 = smov (!%p317_p10, %s734_s15), 3  ;;  %v760_v3 = vld [vmem:[%s1142_s1] sm:$0xff]  ;;  %vm548_vm11 = vcmask 7168  }
  0x18   : > { %811 = vset.pattern.permute.xlu0 %v939_v1  ;;  %812 = vset.pattern.permute.xlu1 %v939_v1  ;;  %v364_v2 = vsel %vm356_vm0, %v761_v0, 0  ;;  %s737_s18 = sshll.u32 %s1158_s15, 3  ;;  %v361_v5 = vsel %vm356_vm0, %v760_v3, 0  ;;  %s735_s8 = sshll.u32 %s1158_s15, 2  ;;  %v813_v10 = vld [vmem:[%s1144_s3] ss:$0 sm:$0xff] }
  0x19   : > { %372 = vmatpush.bf16.xpose.msra.mxu0 %v364_v2  ;;  %s326_s21 = scalar_lea.vmem %s1143_s2, %s737_s18  ;;  %s332_s29 = scalar_lea.vmem %s1145_s4, %s737_s18  ;;  %v814_v29 = vld [vmem:[%s1146_s5] ss:$0 sm:$0xff] }
  0x1a   : > { %v380_v4 = vld [vmem:[%s326_s21] sm:$0xff]  ;;  %s320_s14 = scalar_lea.vmem %s1152_s0, %s735_s8  ;;  %v381_v7 = vld [vmem:[%s326_s21 + $0x8] sm:$0xff]  ;;  %s755_s21 = sshll.u32 %s1001_s28, 3 }
  0x1b   : > { %385 = vperm.xlu0 %811, %v380_v4   ;;  %v428_v6 = vld [vmem:[%s332_s29] sm:$0xff]  ;;  %v429_v9 = vld [vmem:[%s332_s29 + $0x8] sm:$0xff]  ;;  %s593_s29 = scalar_lea.hbm %s1147_s6, %s755_s21  ;;  %s315_s8 = scalar_lea.vmem [#allocation4], %s732_s20 }
  0x1c   : > { %432 = vperm.xlu1 %812, %v428_v6   ;;  %v759_v8 = vld [vmem:[%s320_s14] sm:$0xff]  ;;  %s609_s9 = sshll.u32 %s315_s8, 4  ;;  %s607_s16 = scalar_lea.hbm %s1148_s7, %s755_s21  ;;  %s1095_s9 = int_to_ptr.vmem [resolvable:$true] %s609_s9 }
  0x1d   : > { %s595_s15 = sshll.u32 %s308_s17, 4  ;;  %s597_s18 = sshll.u32 %s593_s29, 4  ;;  %s596_s15 = int_to_ptr.vmem [resolvable:$true] %s595_s15  ;;  %s598_s18 = int_to_ptr.hbm [resolvable:$true] %s597_s18 }
  0x1e   : > { %s611_s0 = sshll.u32 %s607_s16, 4  ;;  %s857_s13 = sshra.s32 %s598_s18, 4  ;;  %s1097_s0 = int_to_ptr.hbm [resolvable:$true] %s611_s0  ;;  %s858_s13 = int_to_ptr.hbm [resolvable:$true] %s857_s13 }
  0x1f   : > { %s859_s20 = scalar_lea.hbm %s858_s13, 8  ;;  %s863_s14 = scalar_lea.hbm %s1147_s6, 16 }
  0x20   : > { %p860_p11 = scmp.ne.s32.totalorder %s858_s13, %s859_s20  ;;  %p864_p0 = scmp.lt.s32.totalorder %s858_s13, %s1147_s6 }
  0x21   : > { %373 = vmatpush.bf16.xpose.msra.mxu0 %v361_v5  ;;  %p865_p1 = scmp.lt.s32.totalorder %s863_s14, %s859_s20 }
  0x22   : > { %p861_p12 = pnand %p860_p11, %p1018_p5 }
  0x23   : > { %390 = vperm.xlu0 %811, %v381_v7   ;;  %p866_p2 = por %p865_p1, %p864_p0 }
  0x24   : > { %435 = vperm.xlu1 %812, %v429_v9   ;;  %p862_p13 = pneg %p861_p12 }
  0x26   : > { %p867_p3 = pnand %p866_p2, %p862_p13 }
  0x28   : > { %752 = vmatmul.msk.bf16.vlgmr.msra.gmra.mxu0 %vm356_vm0, %v759_v8 }
  0x8d   : > { %v386_v11 = vpop.permute.xlu0 %385 }
  0x8e   : > { %v396_v12 = vadd.f32 %v813_v10, %v386_v11  ;;  %v433_v30 = vpop.permute.xlu1 %432 }
  0x8f   : > { %vm438_vm1 = vcmp.eq.s32.totalorder %v433_v30, %v814_v29 }
  0x95   : > { %v391_v17 = vpop.permute.xlu0 %390 }
  0x96   : > { %v397_v19 = vadd.f32 %v813_v10, %v391_v17  ;;  %v436_v46 = vpop.permute.xlu1 %435 }
  0x97   : > { %vm439_vm6 = vcmp.eq.s32.totalorder %v436_v46, %v814_v29 }
  0xa5   : > { %v375_v13 = vpop.f32.mrf.mxu0 }
  0xa6   : > { %v398_v14 = vmul.f32 2.0, %v375_v13 }
  0xa8   : > { %v400_v15 = vsub.f32 %v396_v12, %v398_v14 }
  0xaa   : > { %v402_v16 = vmax.f32 %v400_v15, 1e-12 }
  0xac   : > { %815 = vrsqrt.f32 %v402_v16  ;;  %vm411_vm2 = vcmp.eq.f32.partialorder %v402_v16, inf  ;;  %v414_v35 = vand.u32 2147483648, %v402_v16  ;;  %vm413_vm3 = vcmp.eq.f32.partialorder %v402_v16, 0.0 }
  0xad   : > { %v377_v18 = vpop.f32.mrf.mxu0 }
  0xae   : > { %v399_v20 = vmul.f32 2.0, %v377_v18 }
  0xb0   : > { %v401_v21 = vsub.f32 %v397_v19, %v399_v20 }
  0xb2   : > { %v816_v22 = vpop.eup %815  ;;  %v403_v23 = vmax.f32 %v401_v21, 1e-12 }
  0xb3   : > { %v405_v24 = vmul.f32 %v816_v22, %v402_v16 }
  0xb4   : > { %817 = vrsqrt.f32 %v403_v23  ;;  %vm423_vm4 = vcmp.eq.f32.partialorder %v403_v23, inf  ;;  %v426_v48 = vand.u32 2147483648, %v403_v23  ;;  %vm425_vm5 = vcmp.eq.f32.partialorder %v403_v23, 0.0 }
  0xb5   : > { %v406_v25 = vmul.f32 %v816_v22, %v405_v24 }
  0xb7   : > { %v407_v26 = vmul.f32 0.5, %v406_v25 }
  0xb9   : > { %v408_v27 = vsub.f32 1.5, %v407_v26 }
  0xba   : > { %v818_v28 = vpop.eup %817 }
  0xbb   : > { %v409_v31 = vmul.f32 %v816_v22, %v408_v27  ;;  %v417_v32 = vmul.f32 %v818_v28, %v403_v23 }
  0xbd   : > { %v410_v33 = vmul.f32 %v409_v31, %v402_v16  ;;  %v418_v34 = vmul.f32 %v818_v28, %v417_v32 }
  0xbf   : > { %v412_v36 = vsel %vm411_vm2, %v402_v16, %v410_v33  ;;  %v419_v37 = vmul.f32 0.5, %v418_v34 }
  0xc0   : > { %v1055_v38 = vsel %vm413_vm3, %v414_v35, %v412_v36 }
  0xc1   : > { %v440_v39 = vsel %vm438_vm1, %v1055_v38, 0.0  ;;  %v476_v40 = vsub.f32 0.0, %v1055_v38  ;;  %v420_v41 = vsub.f32 1.5, %v419_v37 }
  0xc2   : > { %v442_v42 = vsel %vm356_vm0, %v440_v39, -inf }
  0xc3   : > { %443 = vmax.xlane.f32.xlu2 %v442_v42  ;;  %v478_v43 = vsel %vm438_vm1, 0.0, %v476_v40  ;;  %v421_v44 = vmul.f32 %v818_v28, %v420_v41 }
  0xc4   : > { %v480_v45 = vsel %vm356_vm0, %v478_v43, -inf }
  0xc5   : > { %481 = vmax.xlane.f32.xlu0 %v480_v45  ;;  %v422_v47 = vmul.f32 %v421_v44, %v403_v23 }
  0xc7   : > { %v424_v49 = vsel %vm423_vm4, %v403_v23, %v422_v47 }
  0xc8   : > { %v427_v50 = vsel %vm425_vm5, %v426_v48, %v424_v49 }
  0xc9   : > { %v441_v51 = vsel %vm439_vm6, %v427_v50, 0.0  ;;  %v477_v52 = vsub.f32 0.0, %v427_v50 }
  0xca   : > { %v445_v53 = vsel %vm356_vm0, %v441_v51, -inf }
  0xcb   : > { %446 = vmax.xlane.f32.xlu2 %v445_v53  ;;  %v479_v54 = vsel %vm439_vm6, 0.0, %v477_v52 }
  0xcc   : > { %v483_v55 = vsel %vm356_vm0, %v479_v54, -inf }
  0xcd   : > { %484 = vmax.xlane.f32.xlu1 %v483_v55 }
 0x136   : > { %v444_v56 = vpop.xlane.xlu2 %443 }
 0x137   : > { %v448_v57 = vsub.f32 %v1055_v38, %v444_v56 }
 0x138   : > { %v482_v58 = vpop.xlane.xlu0 %481 }
 0x139   : > { %v450_v59 = vsel %vm438_vm1, %v448_v57, -1e+30  ;;  %v486_v60 = vsub.f32 %v476_v40, %v482_v58 }
 0x13a   : > { %v452_v61 = vmul.f32 1.442695, %v450_v59 }
 0x13b   : > { %v488_v62 = vsel %vm438_vm1, -1e+30, %v486_v60 }
 0x13c   : > { %819 = vpow2.f32 %v452_v61  ;;  %v490_v63 = vmul.f32 1.442695, %v488_v62 }
 0x13e   : > { %821 = vpow2.f32 %v490_v63  ;;  %v447_v0 = vpop.xlane.xlu2 %446 }
 0x13f   : > { %v449_v2 = vsub.f32 %v427_v50, %v447_v0 }
 0x140   : > { %v485_v3 = vpop.xlane.xlu1 %484 }
 0x141   : > { %v487_v4 = vsub.f32 %v477_v52, %v485_v3  ;;  %v451_v6 = vsel %vm439_vm6, %v449_v2, -1e+30 }
 0x142   : > { %v820_v5 = vpop.eup %819  ;;  %v454_v12 = vmul.f32 1.442695, %v451_v6 }
 0x143   : > { %v489_v7 = vsel %vm439_vm6, -1e+30, %v487_v4  ;;  %v456_v8 = vsel %vm356_vm0, %v820_v5, 0.0  ;;  %v464_v21 = vmul.f32 %v820_v5, %v1055_v38 }
 0x144   : > { %v822_v9 = vpop.eup %821  ;;  %v492_v10 = vmul.f32 1.442695, %v489_v7  ;;  %457 = vadd.xlane.f32.xlu2 %v456_v8 }
 0x145   : > { %v502_v11 = vmul.f32 %v822_v9, %v1055_v38  ;;  %v494_v14 = vsel %vm356_vm0, %v822_v9, 0.0  ;;  %v466_v22 = vsel %vm356_vm0, %v464_v21, 0.0 }
 0x146   : > { %823 = vpow2.f32 %v492_v10 }
 0x147   : > { %v504_v13 = vsel %vm356_vm0, %v502_v11, 0.0  ;;  %825 = vpow2.f32 %v454_v12 }
 0x148   : > { %505 = vadd.xlane.f32.xlu0 %v504_v13 }
 0x14c   : > { %v824_v15 = vpop.eup %823  ;;  %495 = vadd.xlane.f32.xlu2 %v494_v14 }
 0x14d   : > { %v503_v16 = vmul.f32 %v824_v15, %v427_v50  ;;  %v826_v18 = vpop.eup %825  ;;  %v497_v20 = vsel %vm356_vm0, %v824_v15, 0.0 }
 0x14e   : > { %v459_v19 = vsel %vm356_vm0, %v826_v18, 0.0  ;;  %v465_v23 = vmul.f32 %v826_v18, %v427_v50 }
 0x14f   : > { %v507_v17 = vsel %vm356_vm0, %v503_v16, 0.0 }
 0x150   : > { %508 = vadd.xlane.f32.xlu1 %v507_v17  ;;  %v469_v24 = vsel %vm356_vm0, %v465_v23, 0.0 }
 0x154   : > { %460 = vadd.xlane.f32.xlu2 %v459_v19 }
 0x15c   : > { %498 = vadd.xlane.f32.xlu2 %v497_v20 }
 0x164   : > { %467 = vadd.xlane.f32.xlu2 %v466_v22 }
 0x16c   : > { %470 = vadd.xlane.f32.xlu2 %v469_v24 }
 0x1b7   : > { %v458_v25 = vpop.xlane.xlu2 %457 }
 0x1b8   : > { %v462_v29 = vadd.f32 1e-06, %v458_v25 }
 0x1bb   : > { %v506_v35 = vpop.xlane.xlu0 %505 }
 0x1bf   : > { %v496_v26 = vpop.xlane.xlu2 %495 }
 0x1c0   : > { %v500_v28 = vadd.f32 1e-06, %v496_v26 }
 0x1c2   : > { %827 = vrcp.f32 %v500_v28 }
 0x1c3   : > { %829 = vrcp.f32 %v462_v29  ;;  %v509_v44 = vpop.xlane.xlu1 %508 }
 0x1c7   : > { %v461_v27 = vpop.xlane.xlu2 %460 }
 0x1c8   : > { %v828_v32 = vpop.eup %827  ;;  %v463_v33 = vadd.f32 1e-06, %v461_v27 }
 0x1c9   : > { %v830_v34 = vpop.eup %829  ;;  %v512_v37 = vmul.f32 %v828_v32, %v506_v35 }
 0x1cf   : > { %v499_v30 = vpop.xlane.xlu2 %498 }
 0x1d0   : > { %v501_v31 = vadd.f32 1e-06, %v499_v30 }
 0x1d2   : > { %831 = vrcp.f32 %v501_v31 }
 0x1d3   : > { %833 = vrcp.f32 %v463_v33 }
 0x1d7   : > { %v468_v36 = vpop.xlane.xlu2 %467 }
 0x1d8   : > { %v474_v38 = vmul.f32 %v830_v34, %v468_v36  ;;  %v832_v41 = vpop.eup %831 }
 0x1d9   : > { %v834_v43 = vpop.eup %833  ;;  %v513_v47 = vmul.f32 %v832_v41, %v509_v44 }
 0x1da   : > { %v514_v39 = vsub.f32 %v512_v37, %v474_v38 }
 0x1dc   : > { %v520_v40 = vand.u32 2147483647, %v514_v39  ;;  %vm563_vm7 = vcmp.ge.f32.partialorder %v514_v39, 0.0  ;;  %v516_v3 = vsub.f32 0.0, %v514_v39 }
 0x1dd   : > { %v565_v51 = vsel %vm563_vm7, 1, %v939_v1 }
 0x1de   : > { %v522_v42 = vsub.f32 0.0, %v520_v40  ;;  %v518_v9 = vmax.f32 %v516_v3, 0.0 }
 0x1df   : > { %v471_v45 = vpop.xlane.xlu2 %470 }
 0x1e0   : > { %v524_v46 = vmul.f32 1.442695, %v522_v42  ;;  %v475_v48 = vmul.f32 %v834_v43, %v471_v45 }
 0x1e2   : > { %835 = vpow2.f32 %v524_v46  ;;  %v515_v49 = vsub.f32 %v513_v47, %v475_v48 }
 0x1e4   : > { %v521_v50 = vand.u32 2147483647, %v515_v49  ;;  %vm564_vm8 = vcmp.ge.f32.partialorder %v515_v49, 0.0 }
 0x1e5   : > { %v566_v52 = vsel %vm564_vm8, 1, %v939_v1  ;;  %v517_v1 = vsub.f32 0.0, %v515_v49 }
 0x1e6   : > { %v523_v53 = vsub.f32 0.0, %v521_v50  ;;  %v567_v54 = vadd.s32 %v566_v52, %v565_v51 }
 0x1e7   : > { %v519_v12 = vmax.f32 %v517_v1, 0.0 }
 0x1e8   : > { %v836_v55 = vpop.eup %835  ;;  %v526_v56 = vmul.f32 1.442695, %v523_v53  ;;  %v568_v19 = vrot.slane %v567_v54, 4 }
 0x1e9   : > { %v528_v57 = vadd.f32 1.0, %v836_v55  ;;  %v531_v58 = vmul.f32 -0.5, %v836_v55  ;;  %v534_v0 = vand.u32 2147483647, %v836_v55 }
 0x1ea   : > { %837 = vpow2.f32 %v526_v56  ;;  %v569_v20 = vadd.s32 %v568_v19, %v567_v54 }
 0x1eb   : > { %839 = vlog2.f32 %v528_v57  ;;  %v532_v62 = vadd.f32 1.0, %v531_v58  ;;  %vm535_vm9 = vcmp.lt.f32.partialorder %v534_v0, 0.0004427343 }
 0x1ec   : > { %v570_v22 = vrot.slane %v569_v20, 2 }
 0x1ed   : > { %v533_v4 = vmul.f32 %v836_v55, %v532_v62 }
 0x1ee   : > { %v571_v25 = vadd.s32 %v570_v22, %v569_v20 }
 0x1f0   : > { %v838_v59 = vpop.eup %837  ;;  %v572_v28 = vrot.slane %v571_v25, 1 }
 0x1f1   : > { %v840_v60 = vpop.eup %839  ;;  %v537_v61 = vadd.f32 1.0, %v838_v59  ;;  %v540_v63 = vmul.f32 -0.5, %v838_v59  ;;  %v543_v6 = vand.u32 2147483647, %v838_v59 }
 0x1f2   : > { %v530_v2 = vmul.f32 0.6931472, %v840_v60  ;;  %v573_v31 = vadd.s32 %v572_v28, %v571_v25 }
 0x1f3   : > { %841 = vlog2.f32 %v537_v61  ;;  %v541_v5 = vadd.f32 1.0, %v540_v63  ;;  %vm544_vm10 = vcmp.lt.f32.partialorder %v543_v6, 0.0004427343 }
 0x1f4   : > { %v536_v7 = vsel %vm535_vm9, %v533_v4, %v530_v2 }
 0x1f5   : > { %v542_v11 = vmul.f32 %v838_v59, %v541_v5  ;;  %v546_v13 = vadd.f32 %v536_v7, %v518_v9 }
 0x1f7   : > { %v549_v16 = vsel %vm548_vm11, %v546_v13, 0.0 }
 0x1f9   : > { %v842_v8 = vpop.eup %841 }
 0x1fa   : > { %v539_v10 = vmul.f32 0.6931472, %v842_v8 }
 0x1fc   : > { %v545_v14 = vsel %vm544_vm10, %v542_v11, %v539_v10 }
 0x1fd   : > { %v547_v15 = vadd.f32 %v545_v14, %v519_v12 }
 0x1ff   : > { %v550_v17 = vsel %vm548_vm11, %v547_v15, 0.0 }
 0x200   : > { %v551_v18 = vadd.f32 %v550_v17, %v549_v16 }
 0x202   : > { %552 = vadd.xlane.f32.xlu2 %v551_v18 }
 0x275   : > { %v553_v21 = vpop.xlane.xlu2 %552 }
 0x276   : > { %v554_v23 = vrot.slane %v553_v21, 4 }
 0x278   : > { %v555_v24 = vadd.f32 %v554_v23, %v553_v21 }
 0x27a   : > { %v556_v26 = vrot.slane %v555_v24, 2 }
 0x27c   : > { %v557_v27 = vadd.f32 %v556_v26, %v555_v24 }
 0x27e   : > { %v558_v29 = vrot.slane %v557_v27, 1 }
 0x280   : > { %v559_v30 = vadd.f32 %v558_v29, %v557_v27 }
 0x282   : > { %762 = vpush %v559_v30 }
 0x283   : > { %764 = vpush %v573_v31 }
 0x2b3   : > { %s763_s28 = spop %762 }
 0x2b4   : > { %v561_v32 = vstv %s763_s28  ;;  %s765_s22 = spop %764 }
 0x2b5   : > { %562 = vst [vmem:[%s308_s17] sm:$0xff] %v561_v32  ;;  %v575_v33 = vstv %s765_s22 }
 0x2b6   : > { %576 = vst [vmem:[%s315_s8] sm:$0xff] %v575_v33 }
 0x2b7   : > { %870 = shalt.err (!%p867_p3)
}
 0x2b8   : > { %766 = dma.vmem_to_hbm [thread:$0]  (%p1018_p5), %s596_s15, 128, %s598_s18, %s578_s23  }
 0x2b9   : > { %s583_s8 = scalar_lea.sflag [#allocation5], %s1085_s19  ;;  %s885_s17 = sshra.s32 %s1097_s0, 4  ;;  %s886_s17 = int_to_ptr.hbm [resolvable:$true] %s885_s17 }
 0x2ba   : > { %s887_s22 = scalar_lea.hbm %s886_s17, 8  ;;  %s891_s20 = scalar_lea.hbm %s1148_s7, 16 }
 0x2bb   : > { %p888_p4 = scmp.ne.s32.totalorder %s886_s17, %s887_s22  ;;  %p892_p9 = scmp.lt.s32.totalorder %s886_s17, %s1148_s7 }
 0x2bc   : > { %p893_p10 = scmp.lt.s32.totalorder %s891_s20, %s887_s22 }
 0x2bd   : > { %p889_p7 = pnand %p888_p4, %p1018_p5 }
 0x2be   : > { %p894_p11 = por %p893_p10, %p892_p9 }
 0x2bf   : > { %p890_p8 = pneg %p889_p7 }
 0x2c1   : > { %p895_p12 = pnand %p894_p11, %p890_p8 }
 0x2c3   : > { %898 = shalt.err (!%p895_p12)
}
 0x2c4   : > { %767 = dma.vmem_to_hbm [thread:$0]  (%p1018_p5), %s1095_s9, 128, %s1097_s0, %s583_s8  }
 0x2c5 PF: > { %p777_p13 = scmp.ge.s32.totalorder %s937_s27, 2  ;;  %s623_s19 = sand.u32 1, %s925_s24  }
 0x2c6   : > { %s624_s15 = scalar_lea.sflag [#allocation3], %s623_s19 }
 0x2c7   : > { %p771_p0 = pnand %p777_p13, %p1022_p6 }
 0x2c9   : > { %p772_p1 = pneg %p771_p0 }
 0x2cb   : > { %916 = dma.done.wait (%p772_p1), %s624_s15, 128  }
 0x2cc   : > { %918 = vsyncadd (%p772_p1), %s624_s15, 4294967168  ;;  %s634_s18 = scalar_lea.sflag [#allocation5], %s623_s19 }
 0x2cd   : > { %920 = dma.done.wait (%p772_p1), %s634_s18, 128  }
 0x2ce   : > { %922 = vsyncadd (%p772_p1), %s634_s18, 4294967168  ;;  %p21_p5 = scmp.ge.s32.totalorder %s1005_s30, 4   ;;  %s1153_s24 = smov %s929_s25 }
 0x2cf   : > { %s1154_s25 = smov %s933_s26  ;;  %s1155_s26 = smov %s1016_s10 }
 0x2d0   : > { %s1156_s27 = smov %s1005_s30  ;;  %23 = sbr.rel (!%p21_p5) target bundleno = 7 (0x7), region = 102 }
 0x2d5   :  { %640 = vsyncpa [#allocation3], 1 }
 0x2d6   :  { %642 = vsyncpa [#allocation3 + $0x1], 1 }
 0x2d7   :  { %643 = vsyncpa [#allocation5], 1 }
 0x2d8   :  { %645 = vsyncpa [#allocation5 + $0x1], 1 }

</bundles_post_ra>
